<compile_context>
chip_gen: v6e
topology: v6e:2x2x1
jax: 0.10.0
libtpu: 0.0.40
codegen_flags: <defaults>
</compile_context>

<pallas_src>
import jax
import jax.numpy as jnp
from jax.experimental import pallas as pl
from jax.experimental.pallas import tpu as pltpu


def _mylinear_kernel(x_ref, wb_ref, o_ref):
    # x_ref : (tm, D_in)   wb_ref: (2, D_out)  [row 0 = weight, row 1 = bias]
    # o_ref : (tm, D_out)
    # Rank-1 structure: out = rowsum(x) * weight + bias  (XLU reduce + VPU FMA)
    s = jnp.sum(x_ref[...], axis=-1, keepdims=True)          # (tm, 1)
    o_ref[...] = s * wb_ref[0:1, :] + wb_ref[1:2, :]          # (tm, D_out)


def _round_up(a, b):
    return (a + b - 1) // b * b


def my_linear(inputs, weight, bias, *, max_tile_m=512):
    """inputs: (..., D_in), weight: (D_out,), bias: (D_out,).  Returns (..., D_out)."""
    *lead, d_in = inputs.shape
    d_out = weight.shape[0]

    x2d = inputs.reshape((-1, d_in)).astype(jnp.float32)
    m = x2d.shape[0]

    # Row tile: multiple of 8 (sublane granularity), capped at max_tile_m.
    tile_m = min(max_tile_m, _round_up(m, 8))
    m_pad = _round_up(m, tile_m)
    if m_pad != m:
        x2d = jnp.pad(x2d, ((0, m_pad - m), (0, 0)))

    # Fold weight + bias into a single tiny resident input: (2, D_out).
    wb = jnp.stack(
        [weight.astype(jnp.float32), bias.astype(jnp.float32)], axis=0
    )

    grid = (m_pad // tile_m,)

    out = pl.pallas_call(
        _mylinear_kernel,
        out_shape=jax.ShapeDtypeStruct((m_pad, d_out), jnp.float32),
        grid=grid,
        in_specs=[
            # x: tiled over rows; last dim full-extent (D_in), so the (8,128)
            # rule is satisfied via the full-array-dim escape.
            pl.BlockSpec((tile_m, d_in), lambda i: (i, 0)),
            # weight+bias: full-extent block, constant index_map -> resident.
            pl.BlockSpec((2, d_out), lambda i: (0, 0)),
        ],
        out_specs=pl.BlockSpec((tile_m, d_out), lambda i: (i, 0)),
        compiler_params=pltpu.CompilerParams(
            dimension_semantics=("parallel",),
        ),
    )(x2d, wb)

    if m_pad != m:
        out = out[:m]
    return out.reshape((*lead, d_out))


if __name__ == "__main__":
    key = jax.random.PRNGKey(0)
    k_x, k_w, k_x2 = jax.random.split(key, 3)

    # Small shapes consistent with the module.
    batch, input_dim, output_dim = 8, 32, 16
    x = jax.random.normal(k_x, (batch, input_dim), dtype=jnp.float32)
    # Deterministic parameter init (torch.randn analogue) and zero bias.
    weight = jax.random.normal(k_w, (output_dim,), dtype=jnp.float32)
    bias = jnp.zeros((output_dim,), dtype=jnp.float32)

    out = my_linear(x, weight, bias)
    out = jax.block_until_ready(out)

    # Reference check against the plain-JAX equivalent of the torch forward.
    w_mat = jnp.broadcast_to(weight[None, :], (input_dim, output_dim))
    ref = x @ w_mat + bias
    assert out.shape == (batch, output_dim)
    assert jnp.allclose(out, ref, atol=1e-5, rtol=1e-5)

    # Second check: M not a multiple of the tile -> exercises the multi-tile
    # grid + row padding path.
    m2 = 1037
    x2 = jax.random.normal(k_x2, (m2, input_dim), dtype=jnp.float32)
    out2 = jax.block_until_ready(my_linear(x2, weight, bias))
    ref2 = x2 @ w_mat + bias
    assert out2.shape == (m2, output_dim)
    assert jnp.allclose(out2, ref2, atol=1e-4, rtol=1e-5)

    print("KERNEL_OK")
</pallas_src>

<mosaic_0001>
module attributes {stable_mosaic.version = 11 : i64} {
  func.func @_mylinear_kernel(%arg0: i32, %arg1: memref<8x32xf32, #tpu.memory_space<vmem>>, %arg2: memref<2x16xf32, #tpu.memory_space<vmem>>, %arg3: memref<8x16xf32, #tpu.memory_space<vmem>>) attributes {dimension_semantics = [#tpu.dimension_semantics<parallel>], iteration_bounds = array<i64: 1>, scalar_prefetch = 0 : i64, scratch_operands = 0 : i64, tpu.core_type = #tpu.core_type<tc>, window_params = [{transform_indices = @transform_0, window_bounds = array<i64: 8, 32>}, {pipeline_mode = #tpu.pipeline_mode<synchronous>, transform_indices = @transform_1, window_bounds = array<i64: 2, 16>}, {transform_indices = @transform_2, window_bounds = array<i64: 8, 16>}]} {
    %c0 = arith.constant 0 : index
    %c0_0 = arith.constant 0 : index
    %0 = vector.load %arg1[%c0, %c0_0] : memref<8x32xf32, #tpu.memory_space<vmem>>, vector<8x32xf32>
    %cst = arith.constant dense<0.000000e+00> : vector<8xf32>
    %1 = vector.multi_reduction <add>, %0, %cst [1] : vector<8x32xf32> to vector<8xf32>
    %2 = vector.shape_cast %1 : vector<8xf32> to vector<8x1xf32>
    %c0_1 = arith.constant 0 : index
    %c0_2 = arith.constant 0 : index
    %3 = vector.load %arg2[%c0_1, %c0_2] : memref<2x16xf32, #tpu.memory_space<vmem>>, vector<1x16xf32>
    %4 = vector.broadcast %2 : vector<8x1xf32> to vector<8x16xf32>
    %5 = vector.broadcast %3 : vector<1x16xf32> to vector<8x16xf32>
    %6 = arith.mulf %4, %5 : vector<8x16xf32>
    %c1 = arith.constant 1 : index
    %c0_3 = arith.constant 0 : index
    %7 = vector.load %arg2[%c1, %c0_3] : memref<2x16xf32, #tpu.memory_space<vmem>>, vector<1x16xf32>
    %8 = vector.broadcast %7 : vector<1x16xf32> to vector<8x16xf32>
    %9 = arith.addf %6, %8 : vector<8x16xf32>
    %c0_4 = arith.constant 0 : index
    %c0_5 = arith.constant 0 : index
    %10 = vector.load %arg3[%c0_4, %c0_5] : memref<8x16xf32, #tpu.memory_space<vmem>>, vector<8x16xf32>
    tpu.vector_store %arg3[%c0_4, %c0_5], %9 {strides = array<i32>} : memref<8x16xf32, #tpu.memory_space<vmem>>, vector<8x16xf32>,
    return
  }
  func.func @transform_0(%arg0: i32) -> (i32, i32) {
    %c0_i32 = arith.constant 0 : i32
    %c0_i32_0 = arith.constant 0 : i32
    return %arg0, %c0_i32 : i32, i32
  }
  func.func @transform_1(%arg0: i32) -> (i32, i32) {
    %c0_i32 = arith.constant 0 : i32
    %c0_i32_0 = arith.constant 0 : i32
    %c0_i32_1 = arith.constant 0 : i32
    return %c0_i32, %c0_i32_0 : i32, i32
  }
  func.func @transform_2(%arg0: i32) -> (i32, i32) {
    %c0_i32 = arith.constant 0 : i32
    %c0_i32_0 = arith.constant 0 : i32
    return %arg0, %c0_i32 : i32, i32
  }
}

</mosaic_0001>

<bundles_post_ra>
// kernel: tpu_custom_call.1
= control target key start
LH: loop header
LB: loop body
LE: loop exit
PB: predicated region body
PF: predicated region fallthrough
CT: control target
= control target key end

     0   :  { %7 = vsyncpa [#allocation3], 0  ;;  %s169_s0 = inlined_call_operand.hbm [shape: f32[8,32], index: 0, kind: input, shape index: {}]   ;;  %s170_s1 = inlined_call_operand.hbm [shape: f32[2,16], index: 1, kind: input, shape index: {}]   ;;  %s171_s2 = inlined_call_operand.hbm [shape: f32[8,16], index: 2, kind: output, shape index: {}]  }
   0x1   :  { %8 = vsyncpa [#allocation6], 0 }
   0x2   :  { %9 = vsyncpa [#allocation4], 0  ;;  %s142_s9 = smov [#allocation2]   ;;  %s143_s11 = smov [#allocation5]  }
   0x3   :  { %s16_s10 = sshll.u32 %s142_s9, 4  ;;  %s26_s12 = sshll.u32 %s143_s11, 4  ;;  %s17_s10 = int_to_ptr.vmem [resolvable:$true] %s16_s10  ;;  %s27_s12 = int_to_ptr.vmem [resolvable:$true] %s26_s12 }
   0x4   :  { %s84_s13 = scalar_lea.vmem %s17_s10, 128  ;;  %p89_p1 = scmp.lt.s32.totalorder %s17_s10, %s17_s10 }
   0x5   :  { %p85_p0 = scmp.ne.s32.totalorder %s17_s10, %s84_s13  ;;  %p90_p2 = scmp.lt.s32.totalorder %s84_s13, %s84_s13 }
   0x7   :  { %p91_p3 = por %p90_p2, %p89_p1 }
   0x9   :  { %p92_p4 = pnand %p91_p3, %p85_p0 }
   0xb   :  { %95 = shalt.err (!%p92_p4)
}
   0xc   :  { %19 = dma.hbm_to_vmem [thread:$0]  %s169_s0, 128, %s17_s10, [#allocation3]  }
   0xd   :  { %s104_s16 = scalar_lea.vmem %s27_s12, 32  ;;  %p109_p6 = scmp.lt.s32.totalorder %s27_s12, %s27_s12 }
   0xe   :  { %p105_p5 = scmp.ne.s32.totalorder %s27_s12, %s104_s16  ;;  %p110_p7 = scmp.lt.s32.totalorder %s104_s16, %s104_s16 }
  0x10   :  { %p111_p8 = por %p110_p7, %p109_p6 }
  0x12   :  { %p112_p9 = pnand %p111_p8, %p105_p5 }
  0x14   :  { %115 = shalt.err (!%p112_p9)
}
  0x15   :  { %29 = dma.hbm_to_vmem [thread:$0]  %s170_s1, 32, %s27_s12, [#allocation6]  }
  0x16   :  { %136 = dma.done.wait [#allocation3], 128  }
  0x17   :  { %137 = vsyncadd [#allocation3], 4294967168 }
  0x18   :  { %138 = dma.done.wait [#allocation6], 32  }
  0x19   :  { %139 = vsyncadd [#allocation6], 4294967264  ;;  %vm37_vm0 = vcmask 261120   ;;  %v36_v0 = vld [vmem:[#allocation2] sm:$0xff]  ;;  %v71_v2 = vld [vmem:[#allocation5] ss:$0 sm:$0xff] }
  0x1a   :  { %v38_v1 = vsel %vm37_vm0, %v36_v0, 0.0  ;;  %v72_v4 = vld [vmem:[#allocation5 + $0x1] ss:$0 sm:$0xff]  ;;  %s144_s0 = smov [#allocation7]   ;;  %vm53_vm1 = vcmask 130048  }
  0x1b   :  { %39 = vadd.xlane.f32.xlu0 %v38_v1  ;;  %s61_s19 = sshll.u32 %s144_s0, 4  ;;  %s62_s19 = int_to_ptr.vmem [resolvable:$true] %s61_s19 }
  0x1c   :  { %s116_s20 = scalar_lea.vmem %s62_s19, 128  ;;  %p121_p11 = scmp.lt.s32.totalorder %s62_s19, %s62_s19 }
  0x1d   :  { %p117_p10 = scmp.ne.s32.totalorder %s62_s19, %s116_s20  ;;  %p122_p12 = scmp.lt.s32.totalorder %s116_s20, %s116_s20 }
  0x1f   :  { %p123_p13 = por %p122_p12, %p121_p11 }
  0x21   :  { %p124_p0 = pnand %p123_p13, %p117_p10 }
  0xa4   :  { %v40_v3 = vpop.xlane.xlu0 %39 }
  0xa5   :  { %v46_v5 = vmul.f32 %v71_v2, %v40_v3 }
  0xa7   :  { %v52_v6 = vadd.f32 %v72_v4, %v46_v5 }
  0xa9   :  { %54 = vst.msk [vmem:[#allocation7] sm:$0xff] %vm53_vm1, %v52_v6 }
  0xaa   :  { %127 = shalt.err (!%p124_p0)
}
  0xab   :  { %64 = dma.vmem_to_hbm [thread:$0]  %s62_s19, 128, %s171_s2, [#allocation4]  }
  0xac   :  { %140 = dma.done.wait [#allocation4], 128  }
  0xad   :  { %141 = vsyncadd [#allocation4], 4294967168 }
  0xae   :  { %68 = vsyncpa [#allocation3], 1 }
  0xaf   :  { %69 = vsyncpa [#allocation6], 1 }
  0xb0   :  { %70 = vsyncpa [#allocation4], 1 }

</bundles_post_ra>
